<compile_context>
chip_gen: v7x
topology: tpu7x:2x2x1
jax: 0.10.0
libtpu: 0.0.40
codegen_flags: <defaults>
</compile_context>

<pallas_src>
import math
import functools

import jax
import jax.numpy as jnp
from jax import lax
from jax.experimental import pallas as pl
from jax.experimental.pallas import tpu as pltpu


def _build_position_encoding(seq_length: int, d_model: int) -> jnp.ndarray:
    """Deterministic sinusoidal table, identical to the PyTorch __init__."""
    position = jnp.arange(seq_length, dtype=jnp.float32)[:, None]              # (S, 1)
    div_term = jnp.exp(
        jnp.arange(0, d_model, 2, dtype=jnp.float32) * (-math.log(10000.0) / d_model)
    )                                                                           # (D/2,)
    pe = jnp.zeros((seq_length, d_model), dtype=jnp.float32)
    pe = pe.at[:, 0::2].set(jnp.sin(position * div_term))
    pe = pe.at[:, 1::2].set(jnp.cos(position * div_term))
    return pe                                                                   # (S, D)


# ---------------------------------------------------------------------------
# Kernels (pure elementwise; operate on lane-dense (tB, tL) blocks)
# ---------------------------------------------------------------------------

def _add_pe_kernel(x_ref, pe_ref, o_ref):
    # x_ref: (tB, tL), pe_ref: (1, tL) -- jnp broadcast along the batch rows.
    o_ref[...] = (x_ref[...] + pe_ref[...]).astype(o_ref.dtype)


def _add_pe_dropout_kernel(x_ref, pe_ref, rand_ref, o_ref, *, keep_prob: float):
    y = x_ref[...] + pe_ref[...]
    # rand_ref holds uniform 31-bit integers in [0, 2^31); signed compare is
    # therefore bias-free.  P(keep) = keep_prob.
    threshold = jnp.int32(int(keep_prob * float(1 << 31)))
    keep = rand_ref[...] < threshold
    scaled = y * jnp.float32(1.0 / keep_prob)
    o_ref[...] = jnp.where(keep, scaled, jnp.zeros_like(scaled)).astype(o_ref.dtype)


# ---------------------------------------------------------------------------
# Wrapper
# ---------------------------------------------------------------------------

_SMALL_BYTES = 2 << 20      # whole slab processed in one grid step below this
_MAX_TILE_BYTES = 2 << 20   # ~2 MiB per input block when tiling the lane axis


def _choose_lane_tile(L: int, itemsize: int) -> int:
    """Largest multiple-of-128 divisor of L whose block is <= _MAX_TILE_BYTES."""
    if L * itemsize <= _MAX_TILE_BYTES or L % 128 != 0:
        return L
    max_elems = max(128, (_MAX_TILE_BYTES // itemsize) // 128 * 128)
    t = min(L, max_elems)
    t -= t % 128
    while t >= 128:
        if L % t == 0:
            return t
        t -= 128
    return L


def positional_encoding_forward(
    x: jnp.ndarray,
    position_encoding: jnp.ndarray,
    *,
    dropout_p: float = 0.1,
    training: bool = False,
    rng_key=None,
) -> jnp.ndarray:
    """x: (B, S, D); position_encoding: (S_full, D) with S_full >= S."""
    B, S, D = x.shape
    L = S * D

    # Slice like PyTorch's position_encoding[:, :x.shape[1], :], then flatten so
    # the kernel sees a lane-dense last dimension.
    pe2 = position_encoding[:S, :].astype(x.dtype).reshape(1, L)
    x2 = x.reshape(B, L)
    itemsize = jnp.dtype(x.dtype).itemsize

    if B * L * itemsize <= _SMALL_BYTES:
        tB, tL = B, L                       # one grid step for the whole slab
    else:
        tB, tL = 1, _choose_lane_tile(L, itemsize)
    grid = (pl.cdiv(B, tB), pl.cdiv(L, tL))

    x_spec = pl.BlockSpec((tB, tL), lambda b, l: (b, l))
    pe_spec = pl.BlockSpec((1, tL), lambda b, l: (0, l))
    rand_spec = pl.BlockSpec((tB, tL), lambda b, l: (b, l))
    out_spec = pl.BlockSpec((tB, tL), lambda b, l: (b, l))
    cparams = pltpu.CompilerParams(dimension_semantics=("parallel", "parallel"))

    use_dropout = bool(training) and float(dropout_p) > 0.0
    if not use_dropout:
        out2 = pl.pallas_call(
            _add_pe_kernel,
            out_shape=jax.ShapeDtypeStruct((B, L), x.dtype),
            grid=grid,
            in_specs=[x_spec, pe_spec],
            out_specs=out_spec,
            compiler_params=cparams,
        )(x2, pe2)
    else:
        if rng_key is None:
            rng_key = jax.random.PRNGKey(0)
        keep_prob = 1.0 - float(dropout_p)
        # Uniform 31-bit integers (bias-free signed threshold compare in-kernel).
        bits = jax.random.bits(rng_key, (B, L), dtype=jnp.uint32)
        rand31 = lax.shift_right_logical(bits, jnp.uint32(1)).astype(jnp.int32)
        out2 = pl.pallas_call(
            functools.partial(_add_pe_dropout_kernel, keep_prob=keep_prob),
            out_shape=jax.ShapeDtypeStruct((B, L), x.dtype),
            grid=grid,
            in_specs=[x_spec, pe_spec, rand_spec],
            out_specs=out_spec,
            compiler_params=cparams,
        )(x2, pe2, rand31)

    return out2.reshape(B, S, D)


if __name__ == "__main__":
    # Module config: d_model=32, seq_length=8, dropout=0.1
    d_model, seq_length, dropout_p = 32, 8, 0.1
    batch = 2

    key = jax.random.PRNGKey(0)
    kx, kdrop = jax.random.split(key)
    x = jax.random.normal(kx, (batch, seq_length, d_model), dtype=jnp.float32)
    pe_table = _build_position_encoding(seq_length, d_model)

    # Eval-mode forward (dropout is identity) -- check against a pure-JAX reference.
    out_eval = positional_encoding_forward(x, pe_table, dropout_p=dropout_p, training=False)
    jax.block_until_ready(out_eval)
    ref = x + pe_table[None, :, :]
    assert out_eval.shape == x.shape and out_eval.dtype == x.dtype
    assert jnp.allclose(out_eval, ref, atol=1e-6), "eval-mode mismatch"

    # Training-mode forward (dropout active, deterministic key).
    out_train = positional_encoding_forward(
        x, pe_table, dropout_p=dropout_p, training=True, rng_key=kdrop
    )
    jax.block_until_ready(out_train)
    assert out_train.shape == x.shape
    # Each element is either exactly dropped (0) or (x + pe) / keep_prob.
    keep_prob = 1.0 - dropout_p
    scaled_ref = ref / keep_prob
    ok = jnp.logical_or(
        jnp.isclose(out_train, 0.0, atol=1e-6),
        jnp.isclose(out_train, scaled_ref, atol=1e-5),
    )
    assert bool(jnp.all(ok)), "training-mode dropout structure mismatch"

    print("KERNEL_OK")
</pallas_src>

<mosaic_0001>
module attributes {stable_mosaic.version = 11 : i64} {
  func.func @_add_pe_kernel(%arg0: i32, %arg1: i32, %arg2: memref<2x256xf32, #tpu.memory_space<vmem>>, %arg3: memref<1x256xf32, #tpu.memory_space<vmem>>, %arg4: memref<2x256xf32, #tpu.memory_space<vmem>>) attributes {dimension_semantics = [#tpu.dimension_semantics<parallel>, #tpu.dimension_semantics<parallel>], iteration_bounds = array<i64: 1, 1>, scalar_prefetch = 0 : i64, scratch_operands = 0 : i64, tpu.core_type = #tpu.core_type<tc>, window_params = [{transform_indices = @transform_0, window_bounds = array<i64: 2, 256>}, {transform_indices = @transform_1, window_bounds = array<i64: 1, 256>}, {transform_indices = @transform_2, window_bounds = array<i64: 2, 256>}]} {
    %c0 = arith.constant 0 : index
    %c0_0 = arith.constant 0 : index
    %0 = vector.load %arg2[%c0, %c0_0] : memref<2x256xf32, #tpu.memory_space<vmem>>, vector<2x256xf32>
    %c0_1 = arith.constant 0 : index
    %c0_2 = arith.constant 0 : index
    %1 = vector.load %arg3[%c0_1, %c0_2] : memref<1x256xf32, #tpu.memory_space<vmem>>, vector<1x256xf32>
    %2 = vector.broadcast %1 : vector<1x256xf32> to vector<2x256xf32>
    %3 = arith.addf %0, %2 : vector<2x256xf32>
    %c0_3 = arith.constant 0 : index
    %c0_4 = arith.constant 0 : index
    %4 = vector.load %arg4[%c0_3, %c0_4] : memref<2x256xf32, #tpu.memory_space<vmem>>, vector<2x256xf32>
    tpu.vector_store %arg4[%c0_3, %c0_4], %3 {strides = array<i32>} : memref<2x256xf32, #tpu.memory_space<vmem>>, vector<2x256xf32>,
    return
  }
  func.func @transform_0(%arg0: i32, %arg1: i32) -> (i32, i32) {
    %c0_i32 = arith.constant 0 : i32
    return %arg0, %arg1 : i32, i32
  }
  func.func @transform_1(%arg0: i32, %arg1: i32) -> (i32, i32) {
    %c0_i32 = arith.constant 0 : i32
    %c0_i32_0 = arith.constant 0 : i32
    return %c0_i32, %arg1 : i32, i32
  }
  func.func @transform_2(%arg0: i32, %arg1: i32) -> (i32, i32) {
    %c0_i32 = arith.constant 0 : i32
    return %arg0, %arg1 : i32, i32
  }
}

</mosaic_0001>

<bundles_post_ra>
// kernel: tpu_custom_call.1
= control target key start
LH: loop header
LB: loop body
LE: loop exit
PB: predicated region body
PF: predicated region fallthrough
CT: control target
= control target key end

     0   :  { %7 = vsyncpa [#allocation3], 0  ;;  %s157_s0 = inlined_call_operand.hbm [shape: f32[2,256], index: 0, kind: input, shape index: {}]   ;;  %s158_s1 = inlined_call_operand.vmem [shape: f32[1,256], index: 1, kind: input, shape index: {}]   ;;  %s159_s2 = inlined_call_operand.hbm [shape: f32[2,256], index: 2, kind: output, shape index: {}]  }
   0x1   :  { %8 = vsyncpa [#allocation4], 0  ;;  %s112_s9 = smov [#allocation2]   ;;  %s64_s13 = scalar_lea.hbm %s157_s0, 64 }
   0x2   :  { %s15_s10 = sshll.u32 %s112_s9, 4  ;;  %p65_p0 = scmp.ne.s32.totalorder %s157_s0, %s64_s13  ;;  %s16_s10 = int_to_ptr.vmem [resolvable:$true] %s15_s10 }
   0x3   :  { %p68_p1 = scmp.lt.u32.totalorder %s64_s13, %s157_s0 }
   0x5   :  { %p70_p2 = pnand %p68_p1, %p65_p0 }
   0x7   :  { %73 = shalt.err (!%p70_p2)
}
   0x8   :  { %s74_s18 = scalar_lea.vmem %s16_s10, 64  ;;  %p79_p4 = scmp.lt.s32.totalorder %s16_s10, %s16_s10 }
   0x9   :  { %p75_p3 = scmp.ne.s32.totalorder %s16_s10, %s74_s18  ;;  %p80_p5 = scmp.lt.s32.totalorder %s74_s18, %s74_s18 }
   0xb   :  { %p81_p6 = por %p80_p5, %p79_p4 }
   0xd   :  { %p82_p7 = pnand %p81_p6, %p75_p3 }
   0xf   :  { %85 = shalt.err (!%p82_p7)
}
  0x10   :  { %18 = dma.hbm_to_vmem [thread:$0]  %s157_s0, 64, %s16_s10, [#allocation3]  }
  0x11   :  { %108 = dma.done.wait [#allocation3], 64  }
  0x12   :  { %109 = vsyncadd [#allocation3], 4294967232  ;;  %v27_v0 = vlaneseq  ;;  %v113_v1 = vmov 1983009808   ;;  %v25_v7 = vld [vmem:[%s158_s1] sm:$0x3] }
  0x13   :  { %v37_v2 = vunpack.c.l.s4 %v113_v1  ;;  %v24_v12 = vld [vmem:[#allocation2] sm:$0xf]  ;;  %s114_s23 = smov [#allocation5]  }
  0x14   :  { %v28_v3 = vshrl.u32 %v27_v0, 7  ;;  %s52_s0 = sshll.u32 %s114_s23, 4  ;;  %s53_s0 = int_to_ptr.vmem [resolvable:$true] %s52_s0 }
  0x15   :  { %v38_v6 = vunpack.c.0.s8 %v37_v2  ;;  %s86_s24 = scalar_lea.vmem %s53_s0, 64  ;;  %p91_p9 = scmp.lt.s32.totalorder %s53_s0, %s53_s0 }
  0x16   :  { %v29_v4 = vsub.s32 0, %v28_v3  ;;  %v33_v5 = vsub.s32 1, %v28_v3  ;;  %p87_p8 = scmp.ne.s32.totalorder %s53_s0, %s86_s24  ;;  %p92_p10 = scmp.lt.s32.totalorder %s86_s24, %s86_s24 }
  0x17   :  { %v41_v10 = vsub.s32 %v38_v6, %v28_v3 }
  0x18   :  { %v30_v8 = vrot.slane %v25_v7, %v29_v4  ;;  %v34_v9 = vrot.slane %v25_v7, %v33_v5  ;;  %p93_p11 = por %p92_p10, %p91_p9 }
  0x1a   :  { %v35_v11 = vcombine.low %v30_v8, %v34_v9  ;;  %p94_p12 = pnand %p93_p11, %p87_p8 }
  0x1c   :  { %v42_v13 = vrot.slane %v35_v11, %v41_v10 }
  0x1e   :  { %v44_v14 = vadd.f32 %v42_v13, %v24_v12 }
  0x20   :  { %45 = vst [vmem:[#allocation5] sm:$0xf] %v44_v14 }
  0x21   :  { %97 = shalt.err (!%p94_p12)
}
  0x22   :  { %s98_s26 = scalar_lea.hbm %s159_s2, 64 }
  0x23   :  { %p99_p13 = scmp.ne.s32.totalorder %s159_s2, %s98_s26  ;;  %p102_p0 = scmp.lt.u32.totalorder %s98_s26, %s159_s2 }
  0x25   :  { %p104_p1 = pnand %p102_p0, %p99_p13 }
  0x27   :  { %107 = shalt.err (!%p104_p1)
}
  0x28   :  { %55 = dma.vmem_to_hbm [thread:$0]  %s53_s0, 64, %s159_s2, [#allocation4]  }
  0x29   :  { %110 = dma.done.wait [#allocation4], 64  }
  0x2a   :  { %111 = vsyncadd [#allocation4], 4294967232 }
  0x2b   :  { %59 = vsyncpa [#allocation3], 1 }
  0x2c   :  { %60 = vsyncpa [#allocation4], 1 }

</bundles_post_ra>
